<compile_context>
chip_gen: v5e
topology: v5e:2x2
jax: 0.10.0
libtpu: 0.0.40
codegen_flags: <defaults>
</compile_context>

<pallas_src>
import functools

import jax
import jax.numpy as jnp
from jax.experimental import pallas as pl
from jax.experimental.pallas import tpu as pltpu


_LANE = 128          # TPU lane width: pad the class (vocab) dim to this
_MAX_TILE_BT = 512   # rows of flat (B*T) processed per grid step
_NEG_INF = -1e9      # fill for padded table columns; exp(-1e9 - m) underflows to 0


def _round_up(x, m):
    return ((x + m - 1) // m) * m


def _bigram_loss_kernel(tok_ref, table_ref, logits_ref, rowloss_ref, *, num_valid_rows):
    # tok_ref:     (TILE_BT, 2) int32   col 0 = idx, col 1 = targets
    # table_ref:   (VP, VP)     f32     resident padded embedding table
    # logits_ref:  (TILE_BT, VP) f32    lane-dense padded logits
    # rowloss_ref: (TILE_BT, 1)  f32    per-row cross-entropy (padded rows -> 0)
    tile_bt = tok_ref.shape[0]
    vp = table_ref.shape[1]

    idx = tok_ref[:, 0:1]                                          # (TILE_BT, 1)
    tgt = tok_ref[:, 1:2]                                          # (TILE_BT, 1)
    col = jax.lax.broadcasted_iota(jnp.int32, (tile_bt, vp), 1)    # (TILE_BT, VP)

    # Embedding lookup as one-hot @ table (fine at VP=128: exactly one MXU tile).
    # TODO(synk): for vocabularies beyond a few hundred, replace the one-hot matmul
    # with a row gather / K-tiled matmul (one-hot is O(BT*V^2) FLOPs for a row copy).
    onehot_idx = (col == idx).astype(jnp.float32)
    logits = jnp.dot(onehot_idx, table_ref[...],
                     preferred_element_type=jnp.float32)           # (TILE_BT, VP)
    logits_ref[...] = logits

    # logsumexp over all VP columns: padded table columns carry _NEG_INF, so they
    # contribute exp(...) == 0 -- no explicit class mask needed here.
    m = jnp.max(logits, axis=-1, keepdims=True)                    # (TILE_BT, 1)
    lse = jnp.log(jnp.sum(jnp.exp(logits - m), axis=-1, keepdims=True)) + m
    tgt_logit = jnp.sum(logits * (col == tgt).astype(jnp.float32),
                        axis=-1, keepdims=True)                    # (TILE_BT, 1)
    row_loss = lse - tgt_logit

    # Zero padded rows (global row >= true B*T) so the wrapper can do a plain sum.
    row0 = pl.program_id(0) * tile_bt
    row = row0 + jax.lax.broadcasted_iota(jnp.int32, (tile_bt, 1), 0)
    rowloss_ref[...] = jnp.where(row < num_valid_rows, row_loss, 0.0)


def _bigram_logits_kernel(tok_ref, table_ref, logits_ref):
    # Inference path: embedding lookup only, no cross-entropy work.
    tile_bt = tok_ref.shape[0]
    vp = table_ref.shape[1]
    idx = tok_ref[:, 0:1]
    col = jax.lax.broadcasted_iota(jnp.int32, (tile_bt, vp), 1)
    onehot_idx = (col == idx).astype(jnp.float32)
    logits_ref[...] = jnp.dot(onehot_idx, table_ref[...],
                              preferred_element_type=jnp.float32)


def bigram_forward(table, idx, targets=None):
    """Equivalent of BigramLanguageModel.forward.

    table:   (V, V) float32 embedding table
    idx:     (B, T) int token ids in [0, V)
    targets: (B, T) int token ids in [0, V) or None
    returns: (logits, loss) where
             targets is None -> logits (B, T, V) float32, loss None
             targets given   -> logits (B*T, V)  float32, loss scalar float32
             (matches the PyTorch .view(B*T, C) behaviour on the training path)
    """
    B, T = idx.shape
    V = table.shape[0]
    BT = B * T

    vp = _round_up(max(V, _LANE), _LANE)                 # lane-dense class dim
    tile_bt = min(_MAX_TILE_BT, _round_up(BT, 8))        # (8,128)-aligned row tile
    bt_pad = _round_up(BT, tile_bt)
    num_tiles = bt_pad // tile_bt

    # Pad the table once: extra rows are unreachable (ids < V); extra columns get
    # _NEG_INF so they drop out of the in-kernel logsumexp for free.
    # TODO(synk): optionally cast the table to bf16 on v6e/v7x (halves VMEM/HBM
    # traffic) at the cost of bf16-rounded logits.
    table_p = jnp.pad(table.astype(jnp.float32), ((0, vp - V), (0, vp - V)),
                      constant_values=_NEG_INF)

    # Pack idx and targets into a single int32 input; padded rows use token id 0
    # (valid row of the table) and are zeroed out of the loss inside the kernel.
    idx_flat = idx.reshape(BT).astype(jnp.int32)
    if targets is None:
        tgt_flat = jnp.zeros((BT,), jnp.int32)
    else:
        tgt_flat = targets.reshape(BT).astype(jnp.int32)
    tok = jnp.stack([idx_flat, tgt_flat], axis=1)        # (BT, 2)
    tok = jnp.pad(tok, ((0, bt_pad - BT), (0, 0)))       # (BT_pad, 2)

    tok_spec = pl.BlockSpec((tile_bt, 2), lambda i: (i, 0))
    table_spec = pl.BlockSpec((vp, vp), lambda i: (0, 0))     # resident across grid
    logits_spec = pl.BlockSpec((tile_bt, vp), lambda i: (i, 0))
    params = pltpu.CompilerParams(
        dimension_semantics=("parallel",),                    # per-tile outputs are disjoint
        vmem_limit_bytes=32 * 1024 * 1024,
    )

    if targets is None:
        logits_p = pl.pallas_call(
            _bigram_logits_kernel,
            grid=(num_tiles,),
            in_specs=[tok_spec, table_spec],
            out_specs=logits_spec,
            out_shape=jax.ShapeDtypeStruct((bt_pad, vp), jnp.float32),
            compiler_params=params,
        )(tok, table_p)
        logits = logits_p[:BT, :V].reshape(B, T, V)
        return logits, None

    logits_p, row_loss = pl.pallas_call(
        functools.partial(_bigram_loss_kernel, num_valid_rows=BT),
        grid=(num_tiles,),
        in_specs=[tok_spec, table_spec],
        out_specs=(logits_spec, pl.BlockSpec((tile_bt, 1), lambda i: (i, 0))),
        out_shape=(
            jax.ShapeDtypeStruct((bt_pad, vp), jnp.float32),
            jax.ShapeDtypeStruct((bt_pad, 1), jnp.float32),
        ),
        compiler_params=params,
    )(tok, table_p)

    logits = logits_p[:BT, :V]                           # (B*T, V), as in PyTorch
    loss = jnp.sum(row_loss) / BT                        # padded rows contribute exactly 0
    return logits, loss


if __name__ == "__main__":
    # Small shapes consistent with the module: char-level vocab, short context.
    vocab_size = 65   # e.g. sorted(set(tiny-shakespeare text))
    B, T = 2, 8

    key = jax.random.PRNGKey(0)
    k_table, k_idx, k_tgt = jax.random.split(key, 3)

    # nn.Embedding default init ~ N(0, 1)
    table = jax.random.normal(k_table, (vocab_size, vocab_size), dtype=jnp.float32)
    idx = jax.random.randint(k_idx, (B, T), 0, vocab_size, dtype=jnp.int32)
    targets = jax.random.randint(k_tgt, (B, T), 0, vocab_size, dtype=jnp.int32)

    logits, loss = bigram_forward(table, idx, targets)
    logits_inf, loss_inf = bigram_forward(table, idx, None)
    jax.block_until_ready((logits, loss, logits_inf))

    # Reference in plain JAX (embedding gather + mean cross-entropy).
    ref_logits = table[idx]                                        # (B, T, V)
    lf = ref_logits.reshape(B * T, vocab_size)
    tf = targets.reshape(B * T)
    ref_loss = jnp.mean(
        jax.scipy.special.logsumexp(lf, axis=-1) - lf[jnp.arange(B * T), tf]
    )

    assert logits.shape == (B * T, vocab_size)
    assert jnp.allclose(logits, lf, atol=1e-5)
    assert logits_inf.shape == (B, T, vocab_size)
    assert jnp.allclose(logits_inf, ref_logits, atol=1e-5)
    assert loss_inf is None
    assert jnp.allclose(loss, ref_loss, atol=1e-5)

    # TODO(synk): generate() (autoregressive multinomial sampling loop) is host-side
    # control flow around repeated forward calls, not a kernel hot path; not implemented.
    print("KERNEL_OK")
</pallas_src>

<mosaic_0001>
module attributes {stable_mosaic.version = 11 : i64} {
  func.func @_bigram_loss_kernel(%arg0: i32, %arg1: memref<16x2xi32, #tpu.memory_space<vmem>>, %arg2: memref<128x128xf32, #tpu.memory_space<vmem>>, %arg3: memref<16x128xf32, #tpu.memory_space<vmem>>, %arg4: memref<16x1xf32, #tpu.memory_space<vmem>>) attributes {dimension_semantics = [#tpu.dimension_semantics<parallel>], iteration_bounds = array<i64: 1>, scalar_prefetch = 0 : i64, scratch_operands = 0 : i64, tpu.core_type = #tpu.core_type<tc>, window_params = [{transform_indices = @transform_0, window_bounds = array<i64: 16, 2>}, {pipeline_mode = #tpu.pipeline_mode<synchronous>, transform_indices = @transform_1, window_bounds = array<i64: 128, 128>}, {transform_indices = @transform_2, window_bounds = array<i64: 16, 128>}, {transform_indices = @transform_3, window_bounds = array<i64: 16, 1>}]} {
    %c0 = arith.constant 0 : index
    %c0_0 = arith.constant 0 : index
    %0 = vector.load %arg1[%c0, %c0_0] : memref<16x2xi32, #tpu.memory_space<vmem>>, vector<16x1xi32>
    %c0_1 = arith.constant 0 : index
    %c1 = arith.constant 1 : index
    %1 = vector.load %arg1[%c0_1, %c1] : memref<16x2xi32, #tpu.memory_space<vmem>>, vector<16x1xi32>
    %2 = tpu.iota {dimensions = array<i32: 1>} : vector<16x128xi32>
    %3 = vector.broadcast %0 : vector<16x1xi32> to vector<16x128xi32>
    %4 = arith.cmpi eq, %2, %3 : vector<16x128xi32>
    %5 = arith.extui %4 : vector<16x128xi1> to vector<16x128xi32>
    %6 = arith.sitofp %5 : vector<16x128xi32> to vector<16x128xf32>
    %c0_2 = arith.constant 0 : index
    %c0_3 = arith.constant 0 : index
    %7 = vector.load %arg2[%c0_2, %c0_3] : memref<128x128xf32, #tpu.memory_space<vmem>>, vector<128x128xf32>
    %cst = arith.constant dense<0.000000e+00> : vector<16x128xf32>
    %8 = tpu.matmul %6, %7, %cst {dimension_numbers = #tpu.dot_dimension_numbers<[1], [0], [0], [1], [0, 0, 1, 1], [], []>} : vector<16x128xf32>, vector<128x128xf32>, vector<16x128xf32> -> vector<16x128xf32>
    %c0_4 = arith.constant 0 : index
    %c0_5 = arith.constant 0 : index
    %9 = vector.load %arg3[%c0_4, %c0_5] : memref<16x128xf32, #tpu.memory_space<vmem>>, vector<16x128xf32>
    tpu.vector_store %arg3[%c0_4, %c0_5], %8 {strides = array<i32>} : memref<16x128xf32, #tpu.memory_space<vmem>>, vector<16x128xf32>,
    %cst_6 = arith.constant dense<0xFF800000> : vector<16xf32>
    %10 = vector.multi_reduction <maximumf>, %8, %cst_6 [1] : vector<16x128xf32> to vector<16xf32>
    %11 = vector.shape_cast %10 : vector<16xf32> to vector<16x1xf32>
    %12 = vector.broadcast %11 : vector<16x1xf32> to vector<16x128xf32>
    %13 = arith.subf %8, %12 : vector<16x128xf32>
    %14 = math.exp %13 : vector<16x128xf32>
    %cst_7 = arith.constant dense<0.000000e+00> : vector<16xf32>
    %15 = vector.multi_reduction <add>, %14, %cst_7 [1] : vector<16x128xf32> to vector<16xf32>
    %16 = vector.shape_cast %15 : vector<16xf32> to vector<16x1xf32>
    %17 = math.log %16 : vector<16x1xf32>
    %18 = arith.addf %17, %11 : vector<16x1xf32>
    %19 = vector.broadcast %1 : vector<16x1xi32> to vector<16x128xi32>
    %20 = arith.cmpi eq, %2, %19 : vector<16x128xi32>
    %21 = arith.extui %20 : vector<16x128xi1> to vector<16x128xi32>
    %22 = arith.sitofp %21 : vector<16x128xi32> to vector<16x128xf32>
    %23 = arith.mulf %8, %22 : vector<16x128xf32>
    %cst_8 = arith.constant dense<0.000000e+00> : vector<16xf32>
    %24 = vector.multi_reduction <add>, %23, %cst_8 [1] : vector<16x128xf32> to vector<16xf32>
    %25 = vector.shape_cast %24 : vector<16xf32> to vector<16x1xf32>
    %26 = arith.subf %18, %25 : vector<16x1xf32>
    %c16_i32 = arith.constant 16 : i32
    %27 = arith.muli %arg0, %c16_i32 : i32
    %28 = tpu.iota {dimensions = array<i32: 0>} : vector<16x1xi32>
    %29 = vector.broadcast %27 : i32 to vector<16x1xi32>
    %30 = arith.addi %29, %28 : vector<16x1xi32>
    %c16_i32_9 = arith.constant 16 : i32
    %31 = vector.broadcast %c16_i32_9 : i32 to vector<16x1xi32>
    %32 = arith.cmpi slt, %30, %31 : vector<16x1xi32>
    %cst_10 = arith.constant 0.000000e+00 : f32
    %33 = vector.broadcast %cst_10 : f32 to vector<16x1xf32>
    %34 = arith.select %32, %26, %33 : vector<16x1xi1>, vector<16x1xf32>
    %c0_11 = arith.constant 0 : index
    %c0_12 = arith.constant 0 : index
    %35 = vector.load %arg4[%c0_11, %c0_12] : memref<16x1xf32, #tpu.memory_space<vmem>>, vector<16x1xf32>
    tpu.vector_store %arg4[%c0_11, %c0_12], %34 {strides = array<i32>} : memref<16x1xf32, #tpu.memory_space<vmem>>, vector<16x1xf32>,
    return
  }
  func.func @transform_0(%arg0: i32) -> (i32, i32) {
    %c0_i32 = arith.constant 0 : i32
    %c0_i32_0 = arith.constant 0 : i32
    return %arg0, %c0_i32 : i32, i32
  }
  func.func @transform_1(%arg0: i32) -> (i32, i32) {
    %c0_i32 = arith.constant 0 : i32
    %c0_i32_0 = arith.constant 0 : i32
    %c0_i32_1 = arith.constant 0 : i32
    return %c0_i32, %c0_i32_0 : i32, i32
  }
  func.func @transform_2(%arg0: i32) -> (i32, i32) {
    %c0_i32 = arith.constant 0 : i32
    %c0_i32_0 = arith.constant 0 : i32
    return %arg0, %c0_i32 : i32, i32
  }
  func.func @transform_3(%arg0: i32) -> (i32, i32) {
    %c0_i32 = arith.constant 0 : i32
    %c0_i32_0 = arith.constant 0 : i32
    return %arg0, %c0_i32 : i32, i32
  }
}

</mosaic_0001>

<bundles_post_ra>
// kernel: tpu_custom_call.1
= control target key start
LH: loop header
LB: loop body
LE: loop exit
PB: predicated region body
PF: predicated region fallthrough
CT: control target
= control target key end

     0   :  { %9 = vsyncpa [#allocation3], 0  ;;  %s309_s0 = inlined_call_operand.vmem [shape: s32[16,2], index: 0, kind: input, shape index: {}]   ;;  %s310_s1 = inlined_call_operand.hbm [shape: f32[128,128], index: 1, kind: input, shape index: {}]   ;;  %s311_s2 = inlined_call_operand.hbm [shape: f32[16,128], index: 2, kind: output, shape index: {0}]   ;;  %s312_s3 = inlined_call_operand.vmem [shape: f32[16,1], index: 3, kind: output, shape index: {1}]  }
   0x1   :  { %10 = vsyncpa [#allocation4], 0  ;;  %s17_s14 = sshll.u32 %s310_s1, 4  ;;  %s257_s15 = smov [#allocation2]   ;;  %s18_s14 = int_to_ptr.hbm [resolvable:$true] %s17_s14 }
   0x2   :  { %s19_s16 = sshll.u32 %s257_s15, 4  ;;  %s258_s17 = smov 128   ;;  %s20_s16 = int_to_ptr.vmem [resolvable:$true] %s19_s16 }
   0x3   :  { %s259_s18 = smov 8  }
   0x4   :  { %25 = dma.hbm_to_vmem [thread:$0]  %s18_s14, 2048, %s20_s16, [#allocation3], %s258_s17, %s258_s17, %s259_s18  }
   0x5   :  { %253 = dma.done.wait [#allocation3], 2048  }
   0x6   :  { %254 = vsyncadd [#allocation3], 4294965248  ;;  %v260_v0 = vmov 0   ;;  %v30_v1 = vld [vmem:[%s309_s0] sm:$0xff]  ;;  %v61_v2 = vld [vmem:[#allocation2 + $0x78] sm:$0xff]  ;;  %v261_v19 = vmov 1   ;;  %v32_v20 = vlaneseq }
   0x7   :  { %194 = vset.pattern.permute.xlu0 %v260_v0  ;;  %62 = vmatpush.msra.mxu0 %v61_v2  ;;  %v60_v3 = vld [vmem:[#allocation2 + $0x70] sm:$0xff]  ;;  %v59_v4 = vld [vmem:[#allocation2 + $0x68] sm:$0xff]  ;;  %v58_v5 = vld [vmem:[#allocation2 + $0x60] sm:$0xff]  ;;  %v262_v23 = vmov 1.0   ;;  %v263_v26 = vmov 0.0   ;;  %s147_s25 = sshll.u32 %s311_s2, 4  ;;  %s148_s25 = int_to_ptr.hbm [resolvable:$true] %s147_s25 }
   0x8   :  { %35 = vperm.xlu0 %194, %v30_v1   ;;  %170 = vmatpush.msra.mxu1 %v61_v2  ;;  %v31_v6 = vld [vmem:[%s309_s0 + $0x8] sm:$0xff]  ;;  %v57_v7 = vld [vmem:[#allocation2 + $0x58] sm:$0xff]  ;;  %v56_v8 = vld [vmem:[#allocation2 + $0x50] sm:$0xff]  ;;  %v33_v21 = vand.u32 127, %v32_v20  ;;  %s264_s0 = smov [#allocation5]   ;;  %vm138_vm4 = vcmask 7168  }
   0x9   :  { %63 = vmatpush.msra.mxu0 %v60_v3  ;;  %v55_v9 = vld [vmem:[#allocation2 + $0x48] sm:$0xff]  ;;  %v54_v10 = vld [vmem:[#allocation2 + $0x40] sm:$0xff]  ;;  %v53_v11 = vld [vmem:[#allocation2 + $0x38] sm:$0xff]  ;;  %195 = vset.pattern.permute.xlu2 %v261_v19  ;;  %s145_s22 = sshll.u32 %s264_s0, 4  ;;  %s146_s22 = int_to_ptr.vmem [resolvable:$true] %s145_s22 }
   0xa   :  { %171 = vmatpush.msra.mxu1 %v60_v3  ;;  %v52_v12 = vld [vmem:[#allocation2 + $0x30] sm:$0xff]  ;;  %v51_v13 = vld [vmem:[#allocation2 + $0x28] sm:$0xff]  ;;  %v50_v14 = vld [vmem:[#allocation2 + $0x20] sm:$0xff]  ;;  %108 = vperm.xlu2 %195, %v30_v1  }
   0xb   :  { %64 = vmatpush.msra.mxu0 %v59_v4  ;;  %v49_v15 = vld [vmem:[#allocation2 + $0x18] sm:$0xff]  ;;  %v48_v16 = vld [vmem:[#allocation2 + $0x10] sm:$0xff]  ;;  %v47_v17 = vld [vmem:[#allocation2 + $0x8] sm:$0xff] }
   0xc   :  { %172 = vmatpush.msra.mxu1 %v59_v4  ;;  %v46_v18 = vld [vmem:[#allocation2] sm:$0xff] }
   0xd   :  { %65 = vmatpush.msra.mxu0 %v58_v5 }
   0xe   :  { %173 = vmatpush.msra.mxu1 %v58_v5 }
   0xf   :  { %66 = vmatpush.msra.mxu0 %v57_v7 }
  0x10   :  { %38 = vperm.xlu0 %194, %v31_v6   ;;  %174 = vmatpush.msra.mxu1 %v57_v7 }
  0x11   :  { %67 = vmatpush.msra.mxu0 %v56_v8 }
  0x12   :  { %175 = vmatpush.msra.mxu1 %v56_v8  ;;  %111 = vperm.xlu2 %195, %v31_v6  }
  0x13   :  { %68 = vmatpush.msra.mxu0 %v55_v9 }
  0x14   :  { %176 = vmatpush.msra.mxu1 %v55_v9 }
  0x15   :  { %69 = vmatpush.msra.mxu0 %v54_v10 }
  0x16   :  { %177 = vmatpush.msra.mxu1 %v54_v10 }
  0x17   :  { %70 = vmatpush.msra.mxu0 %v53_v11 }
  0x18   :  { %178 = vmatpush.msra.mxu1 %v53_v11  ;;  %196 = vset.pattern.permute.xlu0 %v261_v19 }
  0x19   :  { %71 = vmatpush.msra.mxu0 %v52_v12 }
  0x1a   :  { %179 = vmatpush.msra.mxu1 %v52_v12 }
  0x1b   :  { %72 = vmatpush.msra.mxu0 %v51_v13 }
  0x1c   :  { %180 = vmatpush.msra.mxu1 %v51_v13 }
  0x1d   :  { %73 = vmatpush.msra.mxu0 %v50_v14 }
  0x1e   :  { %181 = vmatpush.msra.mxu1 %v50_v14 }
  0x1f   :  { %74 = vmatpush.msra.mxu0 %v49_v15 }
  0x20   :  { %182 = vmatpush.msra.mxu1 %v49_v15 }
  0x21   :  { %75 = vmatpush.msra.mxu0 %v48_v16 }
  0x22   :  { %183 = vmatpush.msra.mxu1 %v48_v16 }
  0x23   :  { %76 = vmatpush.msra.mxu0 %v47_v17 }
  0x24   :  { %184 = vmatpush.msra.mxu1 %v47_v17 }
  0x25   :  { %77 = vmatpush.msra.mxu0 %v46_v18 }
  0x26   :  { %185 = vmatpush.msra.mxu1 %v46_v18 }
  0x64   :  { %v109_v25 = vpop.permute.xlu2 %108 }
  0x65   :  { %vm113_vm2 = vcmp.eq.s32.totalorder %v33_v21, %v109_v25 }
  0x66   :  { %v168_v27 = vsel %vm113_vm2, 1.0, %v263_v26 }
  0x6c   :  { %v112_v38 = vpop.permute.xlu2 %111 }
  0x6d   :  { %vm114_vm3 = vcmp.eq.s32.totalorder %v33_v21, %v112_v38 }
  0x6e   :  { %v169_v40 = vsel %vm114_vm3, 1.0, %v263_v26 }
  0x7a   :  { %v36_v22 = vpop.permute.xlu0 %35 }
  0x7b   :  { %vm40_vm0 = vcmp.eq.s32.totalorder %v33_v21, %v36_v22 }
  0x7c   :  { %166 = vmatmul.msk.f32.vlgmr.msra.gmra.mxu0 %vm40_vm0, %v262_v23 }
  0x82   :  { %v39_v24 = vpop.permute.xlu0 %38 }
  0x83   :  { %vm41_vm1 = vcmp.eq.s32.totalorder %v33_v21, %v39_v24 }
  0x84   :  { %167 = vmatmul.msk.f32.vlgmr.msra.gmra.mxu1 %vm41_vm1, %v262_v23 }
  0xf9   :  { %v79_v28 = vpop.f32.mrf.mxu0 }
  0xfa   :  { %85 = vst [vmem:[#allocation5] sm:$0xff] %v79_v28  ;;  %87 = vmax.xlane.f32.xlu1 %v79_v28  ;;  %v119_v29 = vmul.f32 %v168_v27, %v79_v28 }
  0xfc   :  { %121 = vadd.xlane.f32.xlu2 %v119_v29 }
 0x101   :  { %v82_v30 = vpop.f32.mrf.mxu1 }
 0x102   :  { %86 = vst [vmem:[#allocation5 + $0x8] sm:$0xff] %v82_v30  ;;  %89 = vmax.xlane.f32.xlu1 %v82_v30  ;;  %v120_v41 = vmul.f32 %v169_v40, %v82_v30 }
 0x103   :  { %153 = dma.vmem_to_hbm [thread:$0]  %s146_s22, 256, %s148_s25, [#allocation4], %s258_s17, %s258_s17, %s259_s18  }
 0x16d   :  { %v88_v31 = vpop.xlane.xlu1 %87 }
 0x16e   :  { %v91_v32 = vsub.f32 %v79_v28, %v88_v31 }
 0x16f   :  { %v122_v47 = vpop.xlane.xlu2 %121 }
 0x170   :  { %v93_v33 = vmul.f32 1.442695, %v91_v32 }
 0x172   :  { %197 = vpow2.f32 %v93_v33 }
 0x175   :  { %v90_v34 = vpop.xlane.xlu1 %89 }
 0x176   :  { %v92_v35 = vsub.f32 %v82_v30, %v90_v34 }
 0x178   :  { %v198_v36 = vpop.eup %197  ;;  %v95_v37 = vmul.f32 1.442695, %v92_v35 }
 0x179   :  { %97 = vadd.xlane.f32.xlu0 %v198_v36 }
 0x17a   :  { %199 = vpow2.f32 %v95_v37 }
 0x180   :  { %v200_v39 = vpop.eup %199 }
 0x181   :  { %99 = vadd.xlane.f32.xlu1 %v200_v39 }
 0x189   :  { %123 = vadd.xlane.f32.xlu1 %v120_v41 }
 0x1ec   :  { %v98_v42 = vpop.xlane.xlu0 %97 }
 0x1ed   :  { %201 = vlog2.f32 %v98_v42 }
 0x1f3   :  { %v202_v43 = vpop.eup %201 }
 0x1f4   :  { %v102_v44 = vmul.f32 0.6931472, %v202_v43  ;;  %v100_v45 = vpop.xlane.xlu1 %99 }
 0x1f5   :  { %203 = vlog2.f32 %v100_v45 }
 0x1f6   :  { %v105_v46 = vadd.f32 %v102_v44, %v88_v31 }
 0x1f8   :  { %v125_v48 = vsub.f32 %v105_v46, %v122_v47 }
 0x1fa   :  { %139 = vst.msk [vmem:[%s312_s3] sm:$0xff] %vm138_vm4, %v125_v48 }
 0x1fb   :  { %v204_v49 = vpop.eup %203 }
 0x1fc   :  { %v104_v50 = vmul.f32 0.6931472, %v204_v49  ;;  %v124_v52 = vpop.xlane.xlu1 %123 }
 0x1fe   :  { %v106_v51 = vadd.f32 %v104_v50, %v90_v34 }
 0x200   :  { %v126_v53 = vsub.f32 %v106_v51, %v124_v52 }
 0x202   :  { %140 = vst.msk [vmem:[%s312_s3 + $0x8] sm:$0xff] %vm138_vm4, %v126_v53 }
 0x203   :  { %255 = dma.done.wait [#allocation4], 256  }
 0x204   :  { %256 = vsyncadd [#allocation4], 4294967040 }
 0x205   :  { %162 = vsyncpa [#allocation3], 1 }
 0x206   :  { %163 = vsyncpa [#allocation4], 1 }

</bundles_post_ra>
